<compile_context>
chip_gen: v7x
topology: tpu7x:2x2x1
jax: 0.10.0
libtpu: 0.0.40
codegen_flags: <defaults>
</compile_context>

<pallas_src>
import functools

import jax
import jax.numpy as jnp
from jax.experimental import pallas as pl
from jax.experimental.pallas import tpu as pltpu


# -----------------------------------------------------------------------------
# small helpers
# -----------------------------------------------------------------------------
def _round_up(x, m):
    return int(pl.cdiv(x, m) * m)


def _pick_tile(n_pad, pref):
    """Largest multiple of 128 that divides n_pad and is <= pref."""
    best = 128
    t = 128
    while t <= min(pref, n_pad):
        if n_pad % t == 0:
            best = t
        t += 128
    return best


def _vmem_limit_bytes():
    # ~3/4 of physical VMEM: 96 MiB on v5e/v6e (128 MiB), 48 MiB on v7x (64 MiB).
    phys = 64 << 20  # conservative default if query unavailable
    try:
        phys = int(pltpu.get_tpu_info().vmem_capacity_bytes)
    except Exception:
        pass
    return (phys * 3) // 4


def pad_node_count(n):
    return _round_up(n, 256)


def prepare_norm_adj(norm_adj, n_pad=None):
    """Pad + bf16-cast the (static) normalized adjacency ONCE, outside the hot path."""
    n = norm_adj.shape[0]
    if n_pad is None:
        n_pad = pad_node_count(n)
    adj_p = jnp.zeros((n_pad, n_pad), jnp.bfloat16)
    return adj_p.at[:n, :n].set(norm_adj.astype(jnp.bfloat16))


# -----------------------------------------------------------------------------
# Kernel 1: fully VMEM-resident fused forward (small / moderate graphs).
# Adjacency is read from HBM exactly once for all layers.
# -----------------------------------------------------------------------------
def _sgl_resident_kernel(adj_ref, ego0_ref, out_ref, *, n_layers):
    adj = adj_ref[...]                       # [Np, Np] bf16
    ego = ego0_ref[...]                      # [Np, Dp] bf16
    acc = ego.astype(jnp.float32)
    for _ in range(n_layers):
        nxt = jnp.dot(adj, ego, preferred_element_type=jnp.float32)
        acc = acc + nxt
        ego = nxt.astype(ego0_ref.dtype)
    out_ref[...] = (acc * (1.0 / float(n_layers + 1))).astype(out_ref.dtype)


# -----------------------------------------------------------------------------
# Kernel 2: one propagation layer, tiled.  grid = (M, K), M parallel.
#   ego_out = adj @ ego          (bf16 out, f32 accumulate)
#   acc_out = (acc_in + adj@ego) * scale      (scale = 1/(L+1) on the last layer)
# ego / acc are carried through HBM between layers (acc aliased in-place).
# -----------------------------------------------------------------------------
def _sgl_layer_kernel(adj_ref, ego_ref, acc_ref, ego_out_ref, acc_out_ref,
                      part_sc, *, scale):
    k = pl.program_id(1)

    @pl.when(k == 0)
    def _():
        part_sc[...] = jnp.zeros_like(part_sc)

    part_sc[...] += jnp.dot(adj_ref[...], ego_ref[...],
                            preferred_element_type=jnp.float32)

    @pl.when(k == pl.num_programs(1) - 1)
    def _():
        new = part_sc[...]                              # [tm, Dp] f32
        ego_out_ref[...] = new.astype(ego_out_ref.dtype)
        s = acc_ref[...] + new
        if scale != 1.0:                                # static: last layer only
            s = s * scale
        acc_out_ref[...] = s


# -----------------------------------------------------------------------------
# SGL_Encoder.forward (perturbed_adj=None path)
# -----------------------------------------------------------------------------
def sgl_encoder_forward(norm_adj, user_emb, item_emb, n_layers,
                        *, force_tiled=False, tile_m=1024, tile_k=1024):
    user_num, emb_size = user_emb.shape
    item_num = item_emb.shape[0]
    n = user_num + item_num

    ego0 = jnp.concatenate([user_emb, item_emb], axis=0)      # [N, D] f32
    if n_layers <= 0:
        return ego0[:user_num], ego0[user_num:]

    d_pad = _round_up(emb_size, 128)          # lane-dense; do NOT pad further
    n_pad = pad_node_count(n)

    # Use a pre-prepared padded bf16 adjacency if given (hoisted out of the
    # hot path); otherwise pad/cast here.
    if norm_adj.shape == (n_pad, n_pad) and norm_adj.dtype == jnp.bfloat16:
        adj_p = norm_adj
    else:
        adj_p = prepare_norm_adj(norm_adj, n_pad)

    ego_p = jnp.zeros((n_pad, d_pad), jnp.bfloat16)
    ego_p = ego_p.at[:n, :emb_size].set(ego0.astype(jnp.bfloat16))

    vmem_limit = _vmem_limit_bytes()

    # Resident-path estimate (gridless call, no double buffering):
    # adj bf16 + ego bf16 + f32 out + ~3 f32 [Np,Dp] temps of the unrolled loop.
    resident_bytes = n_pad * n_pad * 2 + n_pad * d_pad * (2 + 4 + 3 * 4)

    if (not force_tiled) and resident_bytes <= (vmem_limit * 4) // 5:
        acc = pl.pallas_call(
            functools.partial(_sgl_resident_kernel, n_layers=n_layers),
            out_shape=jax.ShapeDtypeStruct((n_pad, d_pad), jnp.float32),
            compiler_params=pltpu.CompilerParams(vmem_limit_bytes=vmem_limit),
        )(adj_p, ego_p)
    else:
        tm = _pick_tile(n_pad, tile_m)
        tk = _pick_tile(n_pad, tile_k)

        # Shrink tiles if the double-buffered blocks + scratch would not fit.
        def _call_bytes(tm_, tk_):
            return (2 * tm_ * tk_ * 2            # adjacency tiles
                    + 2 * tk_ * d_pad * 2        # ego input tiles
                    + 2 * tm_ * d_pad * 4        # acc input block
                    + 2 * tm_ * d_pad * 2        # ego output block
                    + 2 * tm_ * d_pad * 4        # acc output block
                    + tm_ * d_pad * 4)           # partial-sum scratch
        while _call_bytes(tm, tk) > (vmem_limit * 4) // 5 and max(tm, tk) > 128:
            if tk >= tm:
                tk = _pick_tile(n_pad, tk - 128)
            else:
                tm = _pick_tile(n_pad, tm - 128)

        grid = (n_pad // tm, n_pad // tk)
        inv = 1.0 / float(n_layers + 1)

        def layer_call(adj, ego, acc, scale):
            return pl.pallas_call(
                functools.partial(_sgl_layer_kernel, scale=scale),
                out_shape=(jax.ShapeDtypeStruct((n_pad, d_pad), jnp.bfloat16),
                           jax.ShapeDtypeStruct((n_pad, d_pad), jnp.float32)),
                grid_spec=pltpu.PrefetchScalarGridSpec(
                    num_scalar_prefetch=0,
                    grid=grid,
                    in_specs=[
                        # adjacency tile, streamed (bf16)
                        pl.BlockSpec((tm, tk), lambda m, k: (m, k)),
                        # previous-layer embeddings, per-K tile
                        pl.BlockSpec((tk, d_pad), lambda m, k: (k, 0)),
                        # running layer sum, per-M tile
                        pl.BlockSpec((tm, d_pad), lambda m, k: (m, 0)),
                    ],
                    out_specs=[
                        pl.BlockSpec((tm, d_pad), lambda m, k: (m, 0)),
                        pl.BlockSpec((tm, d_pad), lambda m, k: (m, 0)),
                    ],
                    scratch_shapes=[pltpu.VMEM((tm, d_pad), jnp.float32)],
                ),
                # acc carried in-place through HBM (input 2 -> output 1).
                input_output_aliases={2: 1},
                compiler_params=pltpu.CompilerParams(
                    # M tiles are independent within a layer -> megacore on v7x.
                    dimension_semantics=("parallel", "arbitrary"),
                    vmem_limit_bytes=vmem_limit,
                ),
            )(adj, ego, acc)

        ego = ego_p
        acc = ego_p.astype(jnp.float32)
        for l in range(n_layers):
            scale = inv if l == n_layers - 1 else 1.0
            ego, acc = layer_call(adj_p, ego, acc, scale)

    all_emb = acc[:n, :emb_size]
    return all_emb[:user_num], all_emb[user_num:]


# Pure-JAX reference for correctness checking.
def sgl_encoder_forward_ref(norm_adj, user_emb, item_emb, n_layers):
    user_num = user_emb.shape[0]
    ego = jnp.concatenate([user_emb, item_emb], axis=0)
    all_embs = [ego]
    for _ in range(n_layers):
        ego = norm_adj @ ego
        all_embs.append(ego)
    mean_emb = jnp.mean(jnp.stack(all_embs, axis=1), axis=1)
    return mean_emb[:user_num], mean_emb[user_num:]


# -----------------------------------------------------------------------------
# Deterministic synthetic parameters / data
# -----------------------------------------------------------------------------
def xavier_uniform(key, shape):
    fan_in, fan_out = shape
    bound = jnp.sqrt(6.0 / (fan_in + fan_out))
    return jax.random.uniform(key, shape, jnp.float32, -bound, bound)


def build_norm_adj(key, user_num, item_num):
    """Dense symmetric-normalized bipartite adjacency  D^-1/2 A D^-1/2."""
    r = (jax.random.uniform(key, (user_num, item_num)) < 0.1).astype(jnp.float32)
    n = user_num + item_num
    adj = jnp.zeros((n, n), jnp.float32)
    adj = adj.at[:user_num, user_num:].set(r)
    adj = adj.at[user_num:, :user_num].set(r.T)
    deg = jnp.sum(adj, axis=1)
    d_inv_sqrt = jnp.where(deg > 0, 1.0 / jnp.sqrt(jnp.maximum(deg, 1e-12)), 0.0)
    return adj * d_inv_sqrt[:, None] * d_inv_sqrt[None, :]


# TODO(synk): graph_reconstruction / random_graph_augment (sparse scipy edge &
# node dropout) and cal_cl_loss (InfoNCE) are training-time utilities outside
# the forward hot path and are not implemented here.

if __name__ == "__main__":
    user_num, item_num = 100, 156          # N = 256 total nodes
    emb_size = 64
    n_layers = 2

    key = jax.random.PRNGKey(0)
    k_u, k_i, k_adj = jax.random.split(key, 3)

    user_emb = xavier_uniform(k_u, (user_num, emb_size))
    item_emb = xavier_uniform(k_i, (item_num, emb_size))
    norm_adj = build_norm_adj(k_adj, user_num, item_num)

    u_ref, i_ref = sgl_encoder_forward_ref(norm_adj, user_emb, item_emb, n_layers)

    # Adjacency is static in SGL -> pad + bf16-cast it once, outside the jit'd
    # hot path, and reuse it for every forward call.
    adj_prepared = jax.block_until_ready(
        prepare_norm_adj(norm_adj, pad_node_count(user_num + item_num)))

    # Path 1: auto-selected (fully VMEM-resident fused kernel at this size).
    fwd = jax.jit(functools.partial(sgl_encoder_forward, n_layers=n_layers))
    user_all, item_all = fwd(adj_prepared, user_emb, item_emb)
    jax.block_until_ready((user_all, item_all))

    # Path 2: force the per-layer streaming kernels with a multi-tile grid
    # (M axis "parallel") so that code path is exercised on-device as well.
    fwd_tiled = jax.jit(functools.partial(
        sgl_encoder_forward, n_layers=n_layers, force_tiled=True,
        tile_m=128, tile_k=128))
    user_t, item_t = fwd_tiled(adj_prepared, user_emb, item_emb)
    jax.block_until_ready((user_t, item_t))

    assert user_all.shape == (user_num, emb_size)
    assert item_all.shape == (item_num, emb_size)
    # bf16 adjacency / embeddings with f32 accumulation -> loosened tolerance.
    tol = dict(atol=2e-2, rtol=2e-2)
    assert jnp.allclose(user_all, u_ref, **tol)
    assert jnp.allclose(item_all, i_ref, **tol)
    assert jnp.allclose(user_t, u_ref, **tol)
    assert jnp.allclose(item_t, i_ref, **tol)

    print("KERNEL_OK")
</pallas_src>

<mosaic_0001>
module attributes {stable_mosaic.version = 11 : i64} {
  func.func @_sgl_resident_kernel(%arg0: memref<256x256xbf16, #tpu.memory_space<vmem>>, %arg1: memref<256x128xbf16, #tpu.memory_space<vmem>>, %arg2: memref<256x128xf32, #tpu.memory_space<vmem>>) attributes {dimension_semantics = [], scalar_prefetch = 0 : i64, scratch_operands = 0 : i64, tpu.core_type = #tpu.core_type<tc>} {
    %c0 = arith.constant 0 : index
    %c0_0 = arith.constant 0 : index
    %0 = vector.load %arg0[%c0, %c0_0] : memref<256x256xbf16, #tpu.memory_space<vmem>>, vector<256x256xbf16>
    %c0_1 = arith.constant 0 : index
    %c0_2 = arith.constant 0 : index
    %1 = vector.load %arg1[%c0_1, %c0_2] : memref<256x128xbf16, #tpu.memory_space<vmem>>, vector<256x128xbf16>
    %2 = arith.extf %1 : vector<256x128xbf16> to vector<256x128xf32>
    %cst = arith.constant dense<0.000000e+00> : vector<256x128xf32>
    %3 = tpu.matmul %0, %1, %cst {dimension_numbers = #tpu.dot_dimension_numbers<[1], [0], [0], [1], [0, 0, 1, 1], [], []>} : vector<256x256xbf16>, vector<256x128xbf16>, vector<256x128xf32> -> vector<256x128xf32>
    %4 = arith.addf %2, %3 : vector<256x128xf32>
    %5 = arith.truncf %3 : vector<256x128xf32> to vector<256x128xbf16>
    %cst_3 = arith.constant dense<0.000000e+00> : vector<256x128xf32>
    %6 = tpu.matmul %0, %5, %cst_3 {dimension_numbers = #tpu.dot_dimension_numbers<[1], [0], [0], [1], [0, 0, 1, 1], [], []>} : vector<256x256xbf16>, vector<256x128xbf16>, vector<256x128xf32> -> vector<256x128xf32>
    %7 = arith.addf %4, %6 : vector<256x128xf32>
    %cst_4 = arith.constant 0.333333343 : f32
    %8 = vector.broadcast %cst_4 : f32 to vector<256x128xf32>
    %9 = arith.mulf %7, %8 : vector<256x128xf32>
    %c0_5 = arith.constant 0 : index
    %c0_6 = arith.constant 0 : index
    %10 = vector.load %arg2[%c0_5, %c0_6] : memref<256x128xf32, #tpu.memory_space<vmem>>, vector<256x128xf32>
    tpu.vector_store %arg2[%c0_5, %c0_6], %9 {strides = array<i32>} : memref<256x128xf32, #tpu.memory_space<vmem>>, vector<256x128xf32>,
    return
  }
}

</mosaic_0001>

<bundles_post_ra>
// kernel: sgl_encoder_forward.1
= control target key start
LH: loop header
LB: loop body
LE: loop exit
PB: predicated region body
PF: predicated region fallthrough
CT: control target
= control target key end

     0   :  { %s1801_s1 = inlined_call_operand.vmem [shape: bf16[256,128], index: 1, kind: input, shape index: {}]   ;;  %s1802_s0 = inlined_call_operand.vmem [shape: bf16[256,256], index: 0, kind: input, shape index: {}]   ;;  %s1803_s2 = inlined_call_operand.vmem [shape: f32[256,128], index: 2, kind: output, shape index: {}]  }
   0x1   :  { %v1204_v0 = vld [vmem:[%s1801_s1 + $0x40] sm:$0xff]   ;;  %v1214_v2 = vld [vmem:[%s1801_s1 + $0x48] sm:$0xff]   ;;  %v1224_v4 = vld [vmem:[%s1801_s1 + $0x50] sm:$0xff]  }
   0x2   :  { %v1209_v1 = vld [vmem:[%s1801_s1] sm:$0xff]   ;;  %1838 = vst [vmem:[#allocation2_spill] sm:$0xff] %v1214_v2  ;;  %v1219_v3 = vld [vmem:[%s1801_s1 + $0x8] sm:$0xff]   ;;  %1840 = vst [vmem:[#allocation4_spill] sm:$0xff] %v1224_v4  ;;  %882 = vmatprep.subr.bf16.mxu0 %v1204_v0 }
   0x3   :  { %1839 = vst [vmem:[#allocation3_spill] sm:$0xff] %v1219_v3  ;;  %883 = vmatpush3.bf16.msra.mxu0 %v1209_v1  ;;  %v1232_v5 = vld [vmem:[%s1801_s1 + $0x10] sm:$0xff]   ;;  %v1237_v6 = vld [vmem:[%s1801_s1 + $0x58] sm:$0xff]   ;;  %v1124_v7 = vld [vmem:[%s1802_s0 + $0x4] ss:$8 sps:$4 sm:$0xff]   ;;  %v76_v48 = vunpack.c.l.bf16 %v1209_v1  ;;  %v77_v51 = vunpack.c.h.bf16 %v1209_v1 }
   0x4   :  { %884 = vmatprep.subr.bf16.mxu0 %v1214_v2  ;;  %1841 = vst [vmem:[#allocation5_spill] sm:$0xff] %v1232_v5  ;;  %1842 = vst [vmem:[#allocation6_spill] sm:$0xff] %v1237_v6  ;;  %396 = vmatprep.mubr.bf16.mxu0 %v1124_v7  ;;  %v1247_v8 = vld [vmem:[%s1801_s1 + $0x18] sm:$0xff]   ;;  %v1252_v9 = vld [vmem:[%s1801_s1 + $0x60] sm:$0xff]  }
   0x5   :  { %1843 = vst [vmem:[#allocation7_spill] sm:$0xff] %v1247_v8  ;;  %605 = vmatprep.mubr.bf16.mxu1 %v1124_v7  ;;  %1844 = vst [vmem:[#allocation8_spill] sm:$0xff] %v1252_v9  ;;  %v1259_v10 = vld [vmem:[%s1801_s1 + $0x20] sm:$0xff]   ;;  %v1264_v11 = vld [vmem:[%s1801_s1 + $0x68] sm:$0xff]  }
   0x6   :  { %1845 = vst [vmem:[#allocation9_spill] sm:$0xff] %v1259_v10  ;;  %1846 = vst [vmem:[#allocation10_spill] sm:$0xff] %v1264_v11  ;;  %v1271_v12 = vld [vmem:[%s1801_s1 + $0x28] sm:$0xff]   ;;  %v1276_v13 = vld [vmem:[%s1801_s1 + $0x70] sm:$0xff]  }
   0x7   :  { %885 = vmatpush3.bf16.msra.mxu0 %v1219_v3  ;;  %1847 = vst [vmem:[#allocation11_spill] sm:$0xff] %v1271_v12  ;;  %1848 = vst [vmem:[#allocation12_spill] sm:$0xff] %v1276_v13  ;;  %v1283_v14 = vld [vmem:[%s1801_s1 + $0x30] sm:$0xff]   ;;  %v1288_v15 = vld [vmem:[%s1801_s1 + $0x78] sm:$0xff]  }
   0x8   :  { %886 = vmatprep.subr.bf16.mxu0 %v1224_v4  ;;  %1849 = vst [vmem:[#allocation13_spill] sm:$0xff] %v1283_v14  ;;  %1850 = vst [vmem:[#allocation14_spill] sm:$0xff] %v1288_v15  ;;  %v1295_v16 = vld [vmem:[%s1801_s1 + $0x38] sm:$0xff]   ;;  %v1302_v17 = vld [vmem:[%s1802_s0] ss:$8 sps:$4 sm:$0xff]  }
   0x9   :  { %1851 = vst [vmem:[#allocation15_spill] sm:$0xff] %v1295_v16  ;;  %v1308_v18 = vld [vmem:[%s1802_s0 + $0x14] ss:$8 sps:$4 sm:$0xff]   ;;  %v1315_v19 = vld [vmem:[%s1802_s0 + $0x10] ss:$8 sps:$4 sm:$0xff]  }
   0xa   :  { %v1320_v20 = vld [vmem:[%s1802_s0 + $0x24] ss:$8 sps:$4 sm:$0xff]   ;;  %v1327_v21 = vld [vmem:[%s1802_s0 + $0x20] ss:$8 sps:$4 sm:$0xff]   ;;  %v1332_v22 = vld [vmem:[%s1802_s0 + $0x34] ss:$8 sps:$4 sm:$0xff]  }
   0xb   :  { %887 = vmatpush3.bf16.msra.mxu0 %v1232_v5  ;;  %v1339_v23 = vld [vmem:[%s1802_s0 + $0x30] ss:$8 sps:$4 sm:$0xff]   ;;  %v1344_v24 = vld [vmem:[%s1802_s0 + $0x44] ss:$8 sps:$4 sm:$0xff]   ;;  %v1351_v25 = vld [vmem:[%s1802_s0 + $0x40] ss:$8 sps:$4 sm:$0xff]  }
   0xc   :  { %888 = vmatprep.subr.bf16.mxu0 %v1237_v6  ;;  %v1356_v26 = vld [vmem:[%s1802_s0 + $0x54] ss:$8 sps:$4 sm:$0xff]   ;;  %v1363_v27 = vld [vmem:[%s1802_s0 + $0x50] ss:$8 sps:$4 sm:$0xff]   ;;  %v1368_v28 = vld [vmem:[%s1802_s0 + $0x64] ss:$8 sps:$4 sm:$0xff]  }
   0xd   :  { %v1375_v29 = vld [vmem:[%s1802_s0 + $0x60] ss:$8 sps:$4 sm:$0xff]   ;;  %v1380_v30 = vld [vmem:[%s1802_s0 + $0x74] ss:$8 sps:$4 sm:$0xff]   ;;  %v1387_v31 = vld [vmem:[%s1802_s0 + $0x70] ss:$8 sps:$4 sm:$0xff]  }
   0xe   :  { %v1392_v32 = vld [vmem:[%s1802_s0 + $0x84] ss:$8 sps:$4 sm:$0xff]   ;;  %v1399_v33 = vld [vmem:[%s1802_s0 + $0x80] ss:$8 sps:$4 sm:$0xff]   ;;  %v1404_v34 = vld [vmem:[%s1802_s0 + $0x94] ss:$8 sps:$4 sm:$0xff]  }
   0xf   :  { %889 = vmatpush3.bf16.msra.mxu0 %v1247_v8  ;;  %v1411_v35 = vld [vmem:[%s1802_s0 + $0x90] ss:$8 sps:$4 sm:$0xff]   ;;  %v1416_v36 = vld [vmem:[%s1802_s0 + $0xa4] ss:$8 sps:$4 sm:$0xff]   ;;  %v1423_v37 = vld [vmem:[%s1802_s0 + $0xa0] ss:$8 sps:$4 sm:$0xff]  }
  0x10   :  { %890 = vmatprep.subr.bf16.mxu0 %v1252_v9  ;;  %v1428_v38 = vld [vmem:[%s1802_s0 + $0xb4] ss:$8 sps:$4 sm:$0xff]   ;;  %v1435_v39 = vld [vmem:[%s1802_s0 + $0xb0] ss:$8 sps:$4 sm:$0xff]   ;;  %v1440_v40 = vld [vmem:[%s1802_s0 + $0xc4] ss:$8 sps:$4 sm:$0xff]  }
  0x11   :  { %v1447_v41 = vld [vmem:[%s1802_s0 + $0xc0] ss:$8 sps:$4 sm:$0xff]   ;;  %v1452_v42 = vld [vmem:[%s1802_s0 + $0xd4] ss:$8 sps:$4 sm:$0xff]   ;;  %v1459_v43 = vld [vmem:[%s1802_s0 + $0xd0] ss:$8 sps:$4 sm:$0xff]  }
  0x12   :  { %v1464_v44 = vld [vmem:[%s1802_s0 + $0xe4] ss:$8 sps:$4 sm:$0xff]   ;;  %v1471_v45 = vld [vmem:[%s1802_s0 + $0xe0] ss:$8 sps:$4 sm:$0xff]   ;;  %v1476_v46 = vld [vmem:[%s1802_s0 + $0xf4] ss:$8 sps:$4 sm:$0xff]  }
  0x13   :  { %891 = vmatpush3.bf16.msra.mxu0 %v1259_v10  ;;  %v1483_v47 = vld [vmem:[%s1802_s0 + $0xf0] ss:$8 sps:$4 sm:$0xff]  }
  0x14   :  { %892 = vmatprep.subr.bf16.mxu0 %v1264_v11 }
  0x17   :  { %893 = vmatpush3.bf16.msra.mxu0 %v1271_v12 }
  0x18   :  { %894 = vmatprep.subr.bf16.mxu0 %v1276_v13 }
  0x1b   :  { %895 = vmatpush3.bf16.msra.mxu0 %v1283_v14 }
  0x1c   :  { %896 = vmatprep.subr.bf16.mxu0 %v1288_v15 }
  0x1f   :  { %897 = vmatpush3.bf16.msra.mxu0 %v1295_v16 }
  0x22   :  { %397 = vmatmul.mubr.bf16.vlgmr.msra.gmra.mrb[0].mxu0 %v1302_v17 }
  0x23   :  { %404 = vmatprep.mubr.bf16.mxu0 %v1308_v18 }
  0x2a   :  { %405 = vmatmul.mubr.bf16.gmra.mrb[4].mxu0 %v1315_v19 }
  0x2b   :  { %412 = vmatprep.mubr.bf16.mxu0 %v1320_v20 }
  0x32   :  { %413 = vmatmul.mubr.bf16.gmra.mrb[8].mxu0 %v1327_v21 }
  0x33   :  { %420 = vmatprep.mubr.bf16.mxu0 %v1332_v22 }
  0x3a   :  { %421 = vmatmul.mubr.bf16.gmra.mrb[12].mxu0 %v1339_v23 }
  0x3b   :  { %428 = vmatprep.mubr.bf16.mxu0 %v1344_v24 }
  0x42   :  { %429 = vmatmul.mubr.bf16.gmra.mrb[16].mxu0 %v1351_v25 }
  0x43   :  { %436 = vmatprep.mubr.bf16.mxu0 %v1356_v26 }
  0x4a   :  { %437 = vmatmul.mubr.bf16.gmra.mrb[20].mxu0 %v1363_v27 }
  0x4b   :  { %444 = vmatprep.mubr.bf16.mxu0 %v1368_v28 }
  0x52   :  { %445 = vmatmul.mubr.bf16.gmra.mrb[24].mxu0 %v1375_v29 }
  0x53   :  { %452 = vmatprep.mubr.bf16.mxu0 %v1380_v30 }
  0x5a   :  { %453 = vmatmul.mubr.bf16.gmra.mrb[28].mxu0 %v1387_v31 }
  0x5b   :  { %460 = vmatprep.mubr.bf16.mxu0 %v1392_v32 }
  0x62   :  { %461 = vmatmul.mubr.bf16.gmra.mrb[32].mxu0 %v1399_v33 }
  0x63   :  { %468 = vmatprep.mubr.bf16.mxu0 %v1404_v34 }
  0x6a   :  { %469 = vmatmul.mubr.bf16.gmra.mrb[36].mxu0 %v1411_v35 }
  0x6b   :  { %476 = vmatprep.mubr.bf16.mxu0 %v1416_v36 }
  0x72   :  { %477 = vmatmul.mubr.bf16.gmra.mrb[40].mxu0 %v1423_v37 }
  0x73   :  { %484 = vmatprep.mubr.bf16.mxu0 %v1428_v38 }
  0x7a   :  { %485 = vmatmul.mubr.bf16.gmra.mrb[44].mxu0 %v1435_v39 }
  0x7b   :  { %492 = vmatprep.mubr.bf16.mxu0 %v1440_v40 }
  0x82   :  { %493 = vmatmul.mubr.bf16.gmra.mrb[48].mxu0 %v1447_v41 }
  0x83   :  { %500 = vmatprep.mubr.bf16.mxu0 %v1452_v42 }
  0x8a   :  { %501 = vmatmul.mubr.bf16.gmra.mrb[52].mxu0 %v1459_v43 }
  0x8b   :  { %508 = vmatprep.mubr.bf16.mxu0 %v1464_v44 }
  0x92   :  { %509 = vmatmul.mubr.bf16.gmra.mrb[56].mxu0 %v1471_v45 }
  0x93   :  { %516 = vmatprep.mubr.bf16.mxu0 %v1476_v46 }
  0x9a   :  { %517 = vmatmul.mubr.bf16.gmra.mrb[60].mxu0 %v1483_v47 }
  0xf5   :  { %v898_v49 = vpop.f32.mrb[0].mxu0 }
  0xf6   :  { %v899_v50 = vpop.f32.mrb[1].mxu0 }
  0xf7   :  { %v1488_v52 = vadd.f32 %v899_v50, %v898_v49  ;;  %v901_v53 = vpop.f32.mrb[2].mxu0 }
  0xf8   :  { %v902_v54 = vpop.f32.mrb[3].mxu0 }
  0xf9   :  { %v1491_v55 = vadd.f32 %v1488_v52, %v76_v48  ;;  %v1493_v56 = vadd.f32 %v902_v54, %v901_v53 }
  0xfb   :  { %1852 = vst [vmem:[#allocation16_spill] sm:$0xff] %v1491_v55  ;;  %v1496_v57 = vadd.f32 %v1493_v56, %v77_v51  ;;  %v1854_v7 = vpack.c.bf16 %v1493_v56, %v1488_v52 }
  0xfd   :  { %1853 = vst [vmem:[#allocation17_spill] sm:$0xff] %v1496_v57  ;;  %v904_v59 = vpop.f32.mrb[4].mxu0 }
  0xfe   :  { %v905_v60 = vpop.f32.mrb[5].mxu0 }
  0xff   :  { %v1500_v61 = vadd.f32 %v905_v60, %v904_v59  ;;  %v907_v62 = vpop.f32.mrb[6].mxu0 }
 0x100   :  { %v908_v63 = vpop.f32.mrb[7].mxu0 }
 0x101   :  { %v1502_v1 = vadd.f32 %v908_v63, %v907_v62 }
 0x105   :  { %v910_v48 = vpop.f32.mrb[8].mxu0 }
 0x106   :  { %v911_v49 = vpop.f32.mrb[9].mxu0 }
 0x107   :  { %v1506_v50 = vadd.f32 %v911_v49, %v910_v48  ;;  %v913_v51 = vpop.f32.mrb[10].mxu0 }
 0x108   :  { %v914_v53 = vpop.f32.mrb[11].mxu0 }
 0x109   :  { %v1508_v54 = vadd.f32 %v914_v53, %v913_v51 }
 0x10d   :  { %v916_v59 = vpop.f32.mrb[12].mxu0 }
 0x10e   :  { %v917_v60 = vpop.f32.mrb[13].mxu0 }
 0x10f   :  { %v1512_v15 = vadd.f32 %v917_v60, %v916_v59  ;;  %v919_v62 = vpop.f32.mrb[14].mxu0 }
 0x110   :  { %v920_v63 = vpop.f32.mrb[15].mxu0 }
 0x111   :  { %v1514_v13 = vadd.f32 %v920_v63, %v919_v62 }
 0x115   :  { %v922_v48 = vpop.f32.mrb[16].mxu0 }
 0x116   :  { %v923_v49 = vpop.f32.mrb[17].mxu0 }
 0x117   :  { %v1518_v11 = vadd.f32 %v923_v49, %v922_v48  ;;  %v925_v51 = vpop.f32.mrb[18].mxu0 }
 0x118   :  { %v926_v53 = vpop.f32.mrb[19].mxu0 }
 0x119   :  { %v1520_v9 = vadd.f32 %v926_v53, %v925_v51 }
 0x11d   :  { %v928_v59 = vpop.f32.mrb[20].mxu0 }
 0x11e   :  { %v929_v60 = vpop.f32.mrb[21].mxu0 }
 0x11f   :  { %v1524_v6 = vadd.f32 %v929_v60, %v928_v59  ;;  %v931_v62 = vpop.f32.mrb[22].mxu0 }
 0x120   :  { %v932_v63 = vpop.f32.mrb[23].mxu0 }
 0x121   :  { %v1526_v4 = vadd.f32 %v932_v63, %v931_v62 }
 0x125   :  { %v934_v48 = vpop.f32.mrb[24].mxu0 }
 0x126   :  { %v935_v49 = vpop.f32.mrb[25].mxu0 }
 0x127   :  { %v1530_v2 = vadd.f32 %v935_v49, %v934_v48  ;;  %v937_v51 = vpop.f32.mrb[26].mxu0  ;;  %v92_v48 = vunpack.c.l.bf16 %v1204_v0 }
 0x128   :  { %v938_v53 = vpop.f32.mrb[27].mxu0 }
 0x129   :  { %v1532_v16 = vadd.f32 %v938_v53, %v937_v51  ;;  %v93_v51 = vunpack.c.h.bf16 %v1204_v0 }
 0x12d   :  { %v940_v59 = vpop.f32.mrb[28].mxu0 }
 0x12e   :  { %v941_v60 = vpop.f32.mrb[29].mxu0 }
 0x12f   :  { %v1536_v14 = vadd.f32 %v941_v60, %v940_v59  ;;  %v943_v62 = vpop.f32.mrb[30].mxu0 }
 0x130   :  { %v944_v63 = vpop.f32.mrb[31].mxu0 }
 0x131   :  { %v1538_v12 = vadd.f32 %v944_v63, %v943_v62 }
 0x135   :  { %v946_v49 = vpop.f32.mrb[32].mxu0 }
 0x136   :  { %v947_v10 = vpop.f32.mrb[33].mxu0 }
 0x137   :  { %v948_v53 = vadd.f32 %v947_v10, %v946_v49  ;;  %v949_v8 = vpop.f32.mrb[34].mxu0 }
 0x138   :  { %v950_v58 = vpop.f32.mrb[35].mxu0 }
 0x139   :  { %v1544_v5 = vadd.f32 %v948_v53, %v92_v48  ;;  %v951_v59 = vadd.f32 %v950_v58, %v949_v8 }
 0x13b   :  { %v1546_v60 = vadd.f32 %v951_v59, %v93_v51  ;;  %v565_v57 = vpack.c.bf16 %v951_v59, %v948_v53  ;;  %v1856_v59 = vpack.c.bf16 %v1508_v54, %v1506_v50 }
 0x13d   :  { %v952_v62 = vpop.f32.mrb[36].mxu0  ;;  %994 = vmatprep.subr.bf16.mxu1 %v565_v57  ;;  %v1855_v57 = vpack.c.bf16 %v1502_v1, %v1500_v61 }
 0x13e   :  { %v953_v63 = vpop.f32.mrb[37].mxu0  ;;  %995 = vmatpush3.bf16.msra.mxu1 %v1854_v7 }
 0x13f   :  { %v1551_v3 = vadd.f32 %v953_v63, %v952_v62  ;;  %v955_v55 = vpop.f32.mrb[38].mxu0 }
 0x140   :  { %v956_v0 = vpop.f32.mrb[39].mxu0 }
 0x141   :  { %v1553_v10 = vadd.f32 %v956_v0, %v955_v55 }
 0x143   :  { %v566_v48 = vpack.c.bf16 %v1553_v10, %v1551_v3 }
 0x145   :  { %v958_v8 = vpop.f32.mrb[40].mxu0  ;;  %996 = vmatprep.subr.bf16.mxu1 %v566_v48 }
 0x146   :  { %v959_v58 = vpop.f32.mrb[41].mxu0  ;;  %997 = vmatpush3.bf16.msra.mxu1 %v1855_v57 }
 0x147   :  { %v1560_v49 = vadd.f32 %v959_v58, %v958_v8  ;;  %v961_v52 = vpop.f32.mrb[42].mxu0 }
 0x148   :  { %v962_v56 = vpop.f32.mrb[43].mxu0 }
 0x149   :  { %v1562_v7 = vadd.f32 %v962_v56, %v961_v52  ;;  %v1859_v52 = vpack.c.bf16 %v1514_v13, %v1512_v15 }
 0x14b   :  { %v567_v55 = vpack.c.bf16 %v1562_v7, %v1560_v49 }
 0x14d   :  { %v964_v51 = vpop.f32.mrb[44].mxu0  ;;  %998 = vmatprep.subr.bf16.mxu1 %v567_v55 }
 0x14e   :  { %v965_v53 = vpop.f32.mrb[45].mxu0  ;;  %999 = vmatpush3.bf16.msra.mxu1 %v1856_v59 }
 0x14f   :  { %v1569_v62 = vadd.f32 %v965_v53, %v964_v51  ;;  %v967_v63 = vpop.f32.mrb[46].mxu0 }
 0x150   :  { %v968_v0 = vpop.f32.mrb[47].mxu0 }
 0x151   :  { %1857 = vst [vmem:[#allocation18_spill] sm:$0xff] %v1569_v62  ;;  %v1571_v48 = vadd.f32 %v968_v0, %v967_v63 }
 0x153   :  { %1858 = vst [vmem:[#allocation19_spill] sm:$0xff] %v1571_v48  ;;  %v568_v8 = vpack.c.bf16 %v1571_v48, %v1569_v62 }
 0x155   :  { %v970_v58 = vpop.f32.mrb[48].mxu0  ;;  %1000 = vmatprep.subr.bf16.mxu1 %v568_v8  ;;  %v1862_v8 = vpack.c.bf16 %v1520_v9, %v1518_v11 }
 0x156   :  { %v971_v57 = vpop.f32.mrb[49].mxu0  ;;  %1001 = vmatpush3.bf16.msra.mxu1 %v1859_v52 }
 0x157   :  { %v1578_v56 = vadd.f32 %v971_v57, %v970_v58  ;;  %v973_v55 = vpop.f32.mrb[50].mxu0 }
 0x158   :  { %v974_v59 = vpop.f32.mrb[51].mxu0 }
 0x159   :  { %1860 = vst [vmem:[#allocation20_spill] sm:$0xff] %v1578_v56  ;;  %v1580_v51 = vadd.f32 %v974_v59, %v973_v55 }
 0x15b   :  { %1861 = vst [vmem:[#allocation21_spill] sm:$0xff] %v1580_v51  ;;  %v569_v53 = vpack.c.bf16 %v1580_v51, %v1578_v56 }
 0x15d   :  { %v976_v63 = vpop.f32.mrb[52].mxu0  ;;  %1002 = vmatprep.subr.bf16.mxu1 %v569_v53  ;;  %v1865_v53 = vpack.c.bf16 %v1526_v4, %v1524_v6 }
 0x15e   :  { %v977_v0 = vpop.f32.mrb[53].mxu0  ;;  %1003 = vmatpush3.bf16.msra.mxu1 %v1862_v8 }
 0x15f   :  { %v1587_v48 = vadd.f32 %v977_v0, %v976_v63  ;;  %v979_v62 = vpop.f32.mrb[54].mxu0 }
 0x160   :  { %v980_v52 = vpop.f32.mrb[55].mxu0 }
 0x161   :  { %1863 = vst [vmem:[#allocation22_spill] sm:$0xff] %v1587_v48  ;;  %v1589_v58 = vadd.f32 %v980_v52, %v979_v62 }
 0x163   :  { %1864 = vst [vmem:[#allocation23_spill] sm:$0xff] %v1589_v58  ;;  %v570_v57 = vpack.c.bf16 %v1589_v58, %v1587_v48 }
 0x165   :  { %v982_v55 = vpop.f32.mrb[56].mxu0  ;;  %1004 = vmatprep.subr.bf16.mxu1 %v570_v57  ;;  %v1866_v57 = vpack.c.bf16 %v1532_v16, %v1530_v2 }
 0x166   :  { %v983_v59 = vpop.f32.mrb[57].mxu0  ;;  %1005 = vmatpush3.bf16.msra.mxu1 %v1865_v53 }
 0x167   :  { %v1596_v51 = vadd.f32 %v983_v59, %v982_v55  ;;  %v985_v56 = vpop.f32.mrb[58].mxu0  ;;  %v1867_v59 = vpack.c.bf16 %v1538_v12, %v1536_v14 }
 0x168   :  { %v986_v8 = vpop.f32.mrb[59].mxu0 }
 0x169   :  { %v1598_v63 = vadd.f32 %v986_v8, %v985_v56 }
 0x16b   :  { %v571_v62 = vpack.c.bf16 %v1598_v63, %v1596_v51 }
 0x16d   :  { %v988_v0 = vpop.f32.mrb[60].mxu0  ;;  %1006 = vmatprep.subr.bf16.mxu1 %v571_v62 }
 0x16e   :  { %v989_v52 = vpop.f32.mrb[61].mxu0  ;;  %1007 = vmatpush3.bf16.msra.mxu1 %v1866_v57 }
 0x16f   :  { %v1605_v58 = vadd.f32 %v989_v52, %v988_v0  ;;  %v991_v48 = vpop.f32.mrb[62].mxu0 }
 0x170   :  { %v992_v53 = vpop.f32.mrb[63].mxu0 }
 0x171   :  { %v1607_v55 = vadd.f32 %v992_v53, %v991_v48  ;;  %v1872_v53 = vld [vmem:[#allocation7_spill] sm:$0xff] }
 0x173   :  { %v572_v56 = vpack.c.bf16 %v1607_v55, %v1605_v58 }
 0x175   :  { %1008 = vmatprep.subr.bf16.mxu1 %v572_v56  ;;  %v82_v56 = vunpack.c.l.bf16 %v1872_v53 }
 0x176   :  { %1009 = vmatpush3.bf16.msra.mxu1 %v1867_v59 }
 0x179   :  { %606 = vmatmul.mubr.bf16.vlgmr.msra.gmra.mrb[0].mxu1 %v1302_v17 }
 0x17a   :  { %613 = vmatprep.mubr.bf16.mxu1 %v1308_v18 }
 0x181   :  { %614 = vmatmul.mubr.bf16.gmra.mrb[4].mxu1 %v1315_v19 }
 0x182   :  { %621 = vmatprep.mubr.bf16.mxu1 %v1320_v20 }
 0x189   :  { %622 = vmatmul.mubr.bf16.gmra.mrb[8].mxu1 %v1327_v21 }
 0x18a   :  { %629 = vmatprep.mubr.bf16.mxu1 %v1332_v22  ;;  %v1868_v22 = vld [vmem:[#allocation16_spill] sm:$0xff] }
 0x191   :  { %630 = vmatmul.mubr.bf16.gmra.mrb[12].mxu1 %v1339_v23 }
 0x192   :  { %637 = vmatprep.mubr.bf16.mxu1 %v1344_v24 }
 0x199   :  { %638 = vmatmul.mubr.bf16.gmra.mrb[16].mxu1 %v1351_v25  ;;  %v1869_v25 = vld [vmem:[#allocation3_spill] sm:$0xff] }
 0x19a   :  { %645 = vmatprep.mubr.bf16.mxu1 %v1356_v26  ;;  %v78_v26 = vunpack.c.l.bf16 %v1869_v25 }
 0x1a1   :  { %646 = vmatmul.mubr.bf16.gmra.mrb[20].mxu1 %v1363_v27 }
 0x1a2   :  { %653 = vmatprep.mubr.bf16.mxu1 %v1368_v28  ;;  %v1870_v28 = vld [vmem:[#allocation17_spill] sm:$0xff] }
 0x1a9   :  { %654 = vmatmul.mubr.bf16.gmra.mrb[24].mxu1 %v1375_v29 }
 0x1aa   :  { %661 = vmatprep.mubr.bf16.mxu1 %v1380_v30  ;;  %v79_v30 = vunpack.c.h.bf16 %v1869_v25 }
 0x1b1   :  { %662 = vmatmul.mubr.bf16.gmra.mrb[28].mxu1 %v1387_v31 }
 0x1b2   :  { %669 = vmatprep.mubr.bf16.mxu1 %v1392_v32 }
 0x1b9   :  { %670 = vmatmul.mubr.bf16.gmra.mrb[32].mxu1 %v1399_v33 }
 0x1ba   :  { %677 = vmatprep.mubr.bf16.mxu1 %v1404_v34  ;;  %v527_v34 = vadd.f32 %v1500_v61, %v78_v26 }
 0x1c1   :  { %678 = vmatmul.mubr.bf16.gmra.mrb[36].mxu1 %v1411_v35 }
 0x1c2   :  { %685 = vmatprep.mubr.bf16.mxu1 %v1416_v36 }
 0x1c9   :  { %686 = vmatmul.mubr.bf16.gmra.mrb[40].mxu1 %v1423_v37 }
 0x1ca   :  { %693 = vmatprep.mubr.bf16.mxu1 %v1428_v38  ;;  %v528_v38 = vadd.f32 %v1502_v1, %v79_v30 }
 0x1d1   :  { %694 = vmatmul.mubr.bf16.gmra.mrb[44].mxu1 %v1435_v39 }
 0x1d2   :  { %701 = vmatprep.mubr.bf16.mxu1 %v1440_v40 }
 0x1d9   :  { %702 = vmatmul.mubr.bf16.gmra.mrb[48].mxu1 %v1447_v41  ;;  %v1871_v41 = vld [vmem:[#allocation5_spill] sm:$0xff] }
 0x1da   :  { %709 = vmatprep.mubr.bf16.mxu1 %v1452_v42  ;;  %v80_v42 = vunpack.c.l.bf16 %v1871_v41 }
 0x1dc   :  { %v529_v48 = vadd.f32 %v1506_v50, %v80_v42 }
 0x1e1   :  { %710 = vmatmul.mubr.bf16.gmra.mrb[52].mxu1 %v1459_v43 }
 0x1e2   :  { %717 = vmatprep.mubr.bf16.mxu1 %v1464_v44 }
 0x1e9   :  { %718 = vmatmul.mubr.bf16.gmra.mrb[56].mxu1 %v1471_v45  ;;  %v81_v45 = vunpack.c.h.bf16 %v1871_v41 }
 0x1ea   :  { %725 = vmatprep.mubr.bf16.mxu1 %v1476_v46 }
 0x1eb   :  { %v530_v0 = vadd.f32 %v1508_v54, %v81_v45 }
 0x1f1   :  { %726 = vmatmul.mubr.bf16.gmra.mrb[60].mxu1 %v1483_v47 }
 0x24c   :  { %v1010_v17 = vpop.f32.mrb[0].mxu1 }
 0x24d   :  { %v1011_v18 = vpop.f32.mrb[1].mxu1 }
 0x24e   :  { %v1012_v19 = vadd.f32 %v1011_v18, %v1010_v17  ;;  %v1013_v20 = vpop.f32.mrb[2].mxu1  ;;  %v83_v18 = vunpack.c.h.bf16 %v1872_v53 }
 0x24f   :  { %v1014_v21 = vpop.f32.mrb[3].mxu1 }
 0x250   :  { %v734_v23 = vadd.f32 %v1012_v19, %v1868_v22  ;;  %v1015_v24 = vadd.f32 %v1014_v21, %v1013_v20  ;;  %v531_v21 = vadd.f32 %v1512_v15, %v82_v56 }
 0x252   :  { %v766_v27 = vmul.f32 0.33333334, %v734_v23  ;;  %v735_v29 = vadd.f32 %v1015_v24, %v1870_v28  ;;  %v532_v24 = vadd.f32 %v1514_v13, %v83_v18 }
 0x254   :  { %798 = vst [vmem:[%s1803_s2] sm:$0xff] %v766_v27  ;;  %v767_v31 = vmul.f32 0.33333334, %v735_v29  ;;  %v1016_v32 = vpop.f32.mrb[4].mxu1  ;;  %v1873_v27 = vld [vmem:[#allocation9_spill] sm:$0xff] }
 0x255   :  { %v1017_v33 = vpop.f32.mrb[5].mxu1  ;;  %v84_v28 = vunpack.c.l.bf16 %v1873_v27 }
 0x256   :  { %799 = vst [vmem:[%s1803_s2 + $0x8] sm:$0xff] %v767_v31  ;;  %v1018_v35 = vadd.f32 %v1017_v33, %v1016_v32  ;;  %v1019_v36 = vpop.f32.mrb[6].mxu1  ;;  %v85_v31 = vunpack.c.h.bf16 %v1873_v27 }
 0x257   :  { %v1020_v37 = vpop.f32.mrb[7].mxu1 }
 0x258   :  { %v736_v39 = vadd.f32 %v1018_v35, %v527_v34  ;;  %v1021_v40 = vadd.f32 %v1020_v37, %v1019_v36  ;;  %v533_v34 = vadd.f32 %v1518_v11, %v84_v28  ;;  %v534_v37 = vadd.f32 %v1520_v9, %v85_v31 }
 0x25a   :  { %v768_v43 = vmul.f32 0.33333334, %v736_v39  ;;  %v737_v44 = vadd.f32 %v1021_v40, %v528_v38  ;;  %v1874_v40 = vld [vmem:[#allocation11_spill] sm:$0xff] }
 0x25b   :  { %v86_v41 = vunpack.c.l.bf16 %v1874_v40 }
 0x25c   :  { %800 = vst [vmem:[%s1803_s2 + $0x10] sm:$0xff] %v768_v43  ;;  %v769_v46 = vmul.f32 0.33333334, %v737_v44  ;;  %v1022_v47 = vpop.f32.mrb[8].mxu1  ;;  %v87_v44 = vunpack.c.h.bf16 %v1874_v40 }
 0x25d   :  { %v1023_v61 = vpop.f32.mrb[9].mxu1 }
 0x25e   :  { %801 = vst [vmem:[%s1803_s2 + $0x18] sm:$0xff] %v769_v46  ;;  %v1024_v1 = vadd.f32 %v1023_v61, %v1022_v47  ;;  %v1025_v8 = vpop.f32.mrb[10].mxu1  ;;  %v535_v47 = vadd.f32 %v1524_v6, %v86_v41  ;;  %v1877_v41 = vld [vmem:[#allocation2_spill] sm:$0xff] }
 0x25f   :  { %v1026_v62 = vpop.f32.mrb[11].mxu1 }
 0x260   :  { %v738_v52 = vadd.f32 %v1024_v1, %v529_v48  ;;  %v1027_v57 = vadd.f32 %v1026_v62, %v1025_v8  ;;  %v536_v1 = vadd.f32 %v1526_v4, %v87_v44 }
 0x262   :  { %v770_v59 = vmul.f32 0.33333334, %v738_v52  ;;  %v739_v17 = vadd.f32 %v1027_v57, %v530_v0  ;;  %v1875_v0 = vld [vmem:[#allocation13_spill] sm:$0xff] }
 0x263   :  { %v88_v52 = vunpack.c.l.bf16 %v1875_v0  ;;  %v89_v56 = vunpack.c.h.bf16 %v1875_v0 }
 0x264   :  { %802 = vst [vmem:[%s1803_s2 + $0x20] sm:$0xff] %v770_v59  ;;  %v771_v50 = vmul.f32 0.33333334, %v739_v17  ;;  %v1028_v19 = vpop.f32.mrb[12].mxu1 }
 0x265   :  { %v1029_v20 = vpop.f32.mrb[13].mxu1  ;;  %v537_v18 = vadd.f32 %v1530_v2, %v88_v52 }
 0x266   :  { %803 = vst [vmem:[%s1803_s2 + $0x28] sm:$0xff] %v771_v50  ;;  %v1030_v54 = vadd.f32 %v1029_v20, %v1028_v19  ;;  %v1031_v22 = vpop.f32.mrb[14].mxu1  ;;  %v538_v20 = vadd.f32 %v1532_v16, %v89_v56 }
 0x267   :  { %v1032_v23 = vpop.f32.mrb[15].mxu1 }
 0x268   :  { %v740_v25 = vadd.f32 %v1030_v54, %v531_v21  ;;  %v1033_v26 = vadd.f32 %v1032_v23, %v1031_v22  ;;  %v1876_v22 = vld [vmem:[#allocation15_spill] sm:$0xff] }
 0x269   :  { %v90_v23 = vunpack.c.l.bf16 %v1876_v22 }
 0x26a   :  { %v772_v29 = vmul.f32 0.33333334, %v740_v25  ;;  %v741_v30 = vadd.f32 %v1033_v26, %v532_v24  ;;  %v91_v26 = vunpack.c.h.bf16 %v1876_v22 }
 0x26c   :  { %804 = vst [vmem:[%s1803_s2 + $0x30] sm:$0xff] %v772_v29  ;;  %v773_v15 = vmul.f32 0.33333334, %v741_v30  ;;  %v1034_v32 = vpop.f32.mrb[16].mxu1  ;;  %v539_v29 = vadd.f32 %v1536_v14, %v90_v23 }
 0x26d   :  { %v1035_v33 = vpop.f32.mrb[17].mxu1 }
 0x26e   :  { %805 = vst [vmem:[%s1803_s2 + $0x38] sm:$0xff] %v773_v15  ;;  %v1036_v13 = vadd.f32 %v1035_v33, %v1034_v32  ;;  %v1037_v35 = vpop.f32.mrb[18].mxu1  ;;  %v540_v15 = vadd.f32 %v1538_v12, %v91_v26  ;;  %v1880_v26 = vld [vmem:[#allocation18_spill] sm:$0xff] }
 0x26f   :  { %v1038_v36 = vpop.f32.mrb[19].mxu1 }
 0x270   :  { %v742_v38 = vadd.f32 %v1036_v13, %v533_v34  ;;  %v1039_v39 = vadd.f32 %v1038_v36, %v1037_v35 }
 0x272   :  { %v774_v42 = vmul.f32 0.33333334, %v742_v38  ;;  %v743_v43 = vadd.f32 %v1039_v39, %v534_v37 }
 0x274   :  { %806 = vst [vmem:[%s1803_s2 + $0x40] sm:$0xff] %v774_v42  ;;  %v775_v11 = vmul.f32 0.33333334, %v743_v43  ;;  %v1040_v45 = vpop.f32.mrb[20].mxu1  ;;  %v94_v42 = vunpack.c.l.bf16 %v1877_v41 }
 0x275   :  { %v1041_v46 = vpop.f32.mrb[21].mxu1 }
 0x276   :  { %807 = vst [vmem:[%s1803_s2 + $0x48] sm:$0xff] %v775_v11  ;;  %v1042_v9 = vadd.f32 %v1041_v46, %v1040_v45  ;;  %v1043_v61 = vpop.f32.mrb[22].mxu1  ;;  %v95_v11 = vunpack.c.h.bf16 %v1877_v41  ;;  %v1884_v41 = vld [vmem:[#allocation21_spill] sm:$0xff] }
 0x277   :  { %v1044_v48 = vpop.f32.mrb[23].mxu1 }
 0x278   :  { %v744_v8 = vadd.f32 %v1042_v9, %v535_v47  ;;  %v1045_v62 = vadd.f32 %v1044_v48, %v1043_v61  ;;  %v543_v9 = vadd.f32 %v1551_v3, %v94_v42 }
 0x27a   :  { %v776_v57 = vmul.f32 0.33333334, %v744_v8  ;;  %v745_v53 = vadd.f32 %v1045_v62, %v536_v1  ;;  %v1878_v62 = vld [vmem:[#allocation4_spill] sm:$0xff] }
 0x27b   :  { %v96_v0 = vunpack.c.l.bf16 %v1878_v62 }
 0x27c   :  { %808 = vst [vmem:[%s1803_s2 + $0x50] sm:$0xff] %v776_v57  ;;  %v777_v6 = vmul.f32 0.33333334, %v745_v53  ;;  %v1046_v59 = vpop.f32.mrb[24].mxu1  ;;  %v97_v53 = vunpack.c.h.bf16 %v1878_v62 }
 0x27d   :  { %v1047_v17 = vpop.f32.mrb[25].mxu1 }
 0x27e   :  { %809 = vst [vmem:[%s1803_s2 + $0x58] sm:$0xff] %v777_v6  ;;  %v1048_v4 = vadd.f32 %v1047_v17, %v1046_v59  ;;  %v1049_v50 = vpop.f32.mrb[26].mxu1  ;;  %v545_v59 = vadd.f32 %v1560_v49, %v96_v0 }
 0x27f   :  { %v1050_v19 = vpop.f32.mrb[27].mxu1 }
 0x280   :  { %v746_v21 = vadd.f32 %v1048_v4, %v537_v18  ;;  %v1051_v54 = vadd.f32 %v1050_v19, %v1049_v50  ;;  %v546_v4 = vadd.f32 %v1562_v7, %v97_v53 }
 0x282   :  { %v778_v24 = vmul.f32 0.33333334, %v746_v21  ;;  %v747_v25 = vadd.f32 %v1051_v54, %v538_v20  ;;  %v1879_v20 = vld [vmem:[#allocation6_spill] sm:$0xff] }
 0x283   :  { %v98_v21 = vunpack.c.l.bf16 %v1879_v20  ;;  %v99_v23 = vunpack.c.h.bf16 %v1879_v20 }
 0x284   :  { %810 = vst [vmem:[%s1803_s2 + $0x60] sm:$0xff] %v778_v24  ;;  %v779_v2 = vmul.f32 0.33333334, %v747_v25  ;;  %v1052_v27 = vpop.f32.mrb[28].mxu1 }
 0x285   :  { %v1053_v28 = vpop.f32.mrb[29].mxu1 }
 0x286   :  { %811 = vst [vmem:[%s1803_s2 + $0x68] sm:$0xff] %v779_v2  ;;  %v1054_v16 = vadd.f32 %v1053_v28, %v1052_v27  ;;  %v1055_v30 = vpop.f32.mrb[30].mxu1  ;;  %v547_v2 = vadd.f32 %v1880_v26, %v98_v21 }
 0x287   :  { %v1056_v31 = vpop.f32.mrb[31].mxu1 }
 0x288   :  { %v748_v32 = vadd.f32 %v1054_v16, %v539_v29  ;;  %v1057_v33 = vadd.f32 %v1056_v31, %v1055_v30  ;;  %v1881_v29 = vld [vmem:[#allocation19_spill] sm:$0xff] }
 0x289   :  { %v548_v16 = vadd.f32 %v1881_v29, %v99_v23 }
 0x28a   :  { %v780_v34 = vmul.f32 0.33333334, %v748_v32  ;;  %v749_v13 = vadd.f32 %v1057_v33, %v540_v15  ;;  %v1882_v15 = vld [vmem:[#allocation8_spill] sm:$0xff] }
 0x28b   :  { %v100_v32 = vunpack.c.l.bf16 %v1882_v15 }
 0x28c   :  { %812 = vst [vmem:[%s1803_s2 + $0x70] sm:$0xff] %v780_v34  ;;  %v781_v35 = vmul.f32 0.33333334, %v749_v13  ;;  %v1058_v36 = vpop.f32.mrb[32].mxu1  ;;  %v101_v13 = vunpack.c.h.bf16 %v1882_v15 }
 0x28d   :  { %v1059_v14 = vpop.f32.mrb[33].mxu1 }
 0x28e   :  { %813 = vst [vmem:[%s1803_s2 + $0x78] sm:$0xff] %v781_v35  ;;  %v1060_v37 = vadd.f32 %v1059_v14, %v1058_v36  ;;  %v1061_v38 = vpop.f32.mrb[34].mxu1  ;;  %v550_v42 = vadd.f32 %v1884_v41, %v101_v13 }
 0x28f   :  { %v1062_v39 = vpop.f32.mrb[35].mxu1 }
 0x290   :  { %v750_v12 = vadd.f32 %v1060_v37, %v1544_v5  ;;  %v1063_v40 = vadd.f32 %v1062_v39, %v1061_v38  ;;  %v1883_v37 = vld [vmem:[#allocation20_spill] sm:$0xff] }
 0x291   :  { %v549_v38 = vadd.f32 %v1883_v37, %v100_v32 }
 0x292   :  { %v782_v43 = vmul.f32 0.33333334, %v750_v12  ;;  %v751_v44 = vadd.f32 %v1063_v40, %v1546_v60  ;;  %v544_v60 = vadd.f32 %v1553_v10, %v95_v11  ;;  %v1885_v11 = vld [vmem:[#allocation10_spill] sm:$0xff] }
 0x294   :  { %814 = vst [vmem:[%s1803_s2 + $0x80] sm:$0xff] %v782_v43  ;;  %v783_v45 = vmul.f32 0.33333334, %v751_v44  ;;  %v1064_v46 = vpop.f32.mrb[36].mxu1 }
 0x295   :  { %v1065_v47 = vpop.f32.mrb[37].mxu1 }
 0x296   :  { %815 = vst [vmem:[%s1803_s2 + $0x88] sm:$0xff] %v783_v45  ;;  %v1066_v5 = vadd.f32 %v1065_v47, %v1064_v46  ;;  %v1067_v61 = vpop.f32.mrb[38].mxu1  ;;  %v102_v45 = vunpack.c.l.bf16 %v1885_v11 }
 0x297   :  { %v1068_v48 = vpop.f32.mrb[39].mxu1 }
 0x298   :  { %v752_v1 = vadd.f32 %v1066_v5, %v543_v9  ;;  %v1069_v8 = vadd.f32 %v1068_v48, %v1067_v61  ;;  %v103_v9 = vunpack.c.h.bf16 %v1885_v11 }
 0x29a   :  { %v784_v52 = vmul.f32 0.33333334, %v752_v1  ;;  %v753_v57 = vadd.f32 %v1069_v8, %v544_v60  ;;  %v1886_v60 = vld [vmem:[#allocation22_spill] sm:$0xff] }
 0x29b   :  { %v551_v1 = vadd.f32 %v1886_v60, %v102_v45 }
 0x29c   :  { %816 = vst [vmem:[%s1803_s2 + $0x90] sm:$0xff] %v784_v52  ;;  %v785_v3 = vmul.f32 0.33333334, %v753_v57  ;;  %v1070_v56 = vpop.f32.mrb[40].mxu1  ;;  %v1887_v52 = vld [vmem:[#allocation23_spill] sm:$0xff] }
 0x29d   :  { %v1071_v6 = vpop.f32.mrb[41].mxu1  ;;  %v552_v57 = vadd.f32 %v1887_v52, %v103_v9 }
 0x29e   :  { %817 = vst [vmem:[%s1803_s2 + $0x98] sm:$0xff] %v785_v3  ;;  %v1072_v10 = vadd.f32 %v1071_v6, %v1070_v56  ;;  %v1073_v17 = vpop.f32.mrb[42].mxu1  ;;  %v1888_v56 = vld [vmem:[#allocation12_spill] sm:$0xff] }
 0x29f   :  { %v1074_v18 = vpop.f32.mrb[43].mxu1  ;;  %v104_v6 = vunpack.c.l.bf16 %v1888_v56 }
 0x2a0   :  { %v754_v50 = vadd.f32 %v1072_v10, %v545_v59  ;;  %v1075_v19 = vadd.f32 %v1074_v18, %v1073_v17  ;;  %v105_v17 = vunpack.c.h.bf16 %v1888_v56 }
 0x2a2   :  { %v786_v54 = vmul.f32 0.33333334, %v754_v50  ;;  %v755_v22 = vadd.f32 %v1075_v19, %v546_v4  ;;  %v553_v19 = vadd.f32 %v1596_v51, %v104_v6 }
 0x2a4   :  { %818 = vst [vmem:[%s1803_s2 + $0xa0] sm:$0xff] %v786_v54  ;;  %v787_v49 = vmul.f32 0.33333334, %v755_v22  ;;  %v1076_v24 = vpop.f32.mrb[44].mxu1  ;;  %v554_v22 = vadd.f32 %v1598_v63, %v105_v17 }
 0x2a5   :  { %v1077_v25 = vpop.f32.mrb[45].mxu1 }
 0x2a6   :  { %819 = vst [vmem:[%s1803_s2 + $0xa8] sm:$0xff] %v787_v49  ;;  %v1078_v7 = vadd.f32 %v1077_v25, %v1076_v24  ;;  %v1079_v27 = vpop.f32.mrb[46].mxu1  ;;  %v1889_v24 = vld [vmem:[#allocation14_spill] sm:$0xff] }
 0x2a7   :  { %v1080_v28 = vpop.f32.mrb[47].mxu1  ;;  %v106_v25 = vunpack.c.l.bf16 %v1889_v24 }
 0x2a8   :  { %v756_v30 = vadd.f32 %v1078_v7, %v547_v2  ;;  %v1081_v31 = vadd.f32 %v1080_v28, %v1079_v27  ;;  %v107_v7 = vunpack.c.h.bf16 %v1889_v24 }
 0x2a9   :  { %v555_v29 = vadd.f32 %v1605_v58, %v106_v25 }
 0x2aa   :  { %v788_v33 = vmul.f32 0.33333334, %v756_v30  ;;  %v757_v34 = vadd.f32 %v1081_v31, %v548_v16  ;;  %v556_v31 = vadd.f32 %v1607_v55, %v107_v7 }
 0x2ac   :  { %820 = vst [vmem:[%s1803_s2 + $0xb0] sm:$0xff] %v788_v33  ;;  %v789_v35 = vmul.f32 0.33333334, %v757_v34  ;;  %v1082_v36 = vpop.f32.mrb[48].mxu1 }
 0x2ad   :  { %v1083_v14 = vpop.f32.mrb[49].mxu1 }
 0x2ae   :  { %821 = vst [vmem:[%s1803_s2 + $0xb8] sm:$0xff] %v789_v35  ;;  %v1084_v39 = vadd.f32 %v1083_v14, %v1082_v36  ;;  %v1085_v12 = vpop.f32.mrb[50].mxu1 }
 0x2af   :  { %v1086_v40 = vpop.f32.mrb[51].mxu1 }
 0x2b0   :  { %v758_v43 = vadd.f32 %v1084_v39, %v549_v38  ;;  %v1087_v44 = vadd.f32 %v1086_v40, %v1085_v12 }
 0x2b2   :  { %v790_v46 = vmul.f32 0.33333334, %v758_v43  ;;  %v759_v47 = vadd.f32 %v1087_v44, %v550_v42 }
 0x2b4   :  { %822 = vst [vmem:[%s1803_s2 + $0xc0] sm:$0xff] %v790_v46  ;;  %v791_v5 = vmul.f32 0.33333334, %v759_v47  ;;  %v1088_v61 = vpop.f32.mrb[52].mxu1 }
 0x2b5   :  { %v1089_v48 = vpop.f32.mrb[53].mxu1 }
 0x2b6   :  { %823 = vst [vmem:[%s1803_s2 + $0xc8] sm:$0xff] %v791_v5  ;;  %v1090_v8 = vadd.f32 %v1089_v48, %v1088_v61  ;;  %v1091_v62 = vpop.f32.mrb[54].mxu1 }
 0x2b7   :  { %v1092_v0 = vpop.f32.mrb[55].mxu1 }
 0x2b8   :  { %v760_v53 = vadd.f32 %v1090_v8, %v551_v1  ;;  %v1093_v3 = vadd.f32 %v1092_v0, %v1091_v62 }
 0x2ba   :  { %v792_v59 = vmul.f32 0.33333334, %v760_v53  ;;  %v761_v10 = vadd.f32 %v1093_v3, %v552_v57 }
 0x2bc   :  { %824 = vst [vmem:[%s1803_s2 + $0xd0] sm:$0xff] %v792_v59  ;;  %v793_v18 = vmul.f32 0.33333334, %v761_v10  ;;  %v1094_v4 = vpop.f32.mrb[56].mxu1 }
 0x2bd   :  { %v1095_v50 = vpop.f32.mrb[57].mxu1 }
 0x2be   :  { %825 = vst [vmem:[%s1803_s2 + $0xd8] sm:$0xff] %v793_v18  ;;  %v1096_v20 = vadd.f32 %v1095_v50, %v1094_v4  ;;  %v1097_v21 = vpop.f32.mrb[58].mxu1 }
 0x2bf   :  { %v1098_v54 = vpop.f32.mrb[59].mxu1 }
 0x2c0   :  { %v762_v23 = vadd.f32 %v1096_v20, %v553_v19  ;;  %v1099_v49 = vadd.f32 %v1098_v54, %v1097_v21 }
 0x2c2   :  { %v794_v26 = vmul.f32 0.33333334, %v762_v23  ;;  %v763_v2 = vadd.f32 %v1099_v49, %v554_v22 }
 0x2c4   :  { %826 = vst [vmem:[%s1803_s2 + $0xe0] sm:$0xff] %v794_v26  ;;  %v795_v51 = vmul.f32 0.33333334, %v763_v2  ;;  %v1100_v27 = vpop.f32.mrb[60].mxu1 }
 0x2c5   :  { %v1101_v28 = vpop.f32.mrb[61].mxu1 }
 0x2c6   :  { %827 = vst [vmem:[%s1803_s2 + $0xe8] sm:$0xff] %v795_v51  ;;  %v1102_v63 = vadd.f32 %v1101_v28, %v1100_v27  ;;  %v1103_v16 = vpop.f32.mrb[62].mxu1 }
 0x2c7   :  { %v1104_v30 = vpop.f32.mrb[63].mxu1 }
 0x2c8   :  { %v764_v15 = vadd.f32 %v1102_v63, %v555_v29  ;;  %v1105_v32 = vadd.f32 %v1104_v30, %v1103_v16 }
 0x2ca   :  { %v796_v33 = vmul.f32 0.33333334, %v764_v15  ;;  %v765_v34 = vadd.f32 %v1105_v32, %v556_v31 }
 0x2cc   :  { %828 = vst [vmem:[%s1803_s2 + $0xf0] sm:$0xff] %v796_v33  ;;  %v797_v13 = vmul.f32 0.33333334, %v765_v34 }
 0x2ce   :  { %829 = vst [vmem:[%s1803_s2 + $0xf8] sm:$0xff] %v797_v13 }

</bundles_post_ra>
